<compile_context>
chip_gen: v7x
topology: tpu7x:2x2x1
jax: 0.10.0
libtpu: 0.0.40
codegen_flags: <defaults>
</compile_context>

<pallas_src>
import jax
import jax.numpy as jnp
from jax.experimental import pallas as pl
from jax.experimental.pallas import tpu as pltpu


LANE = 128      # TPU lane width; batch tiles are multiples of this
IN_PAD = 8      # state_dim (4) padded to a sublane-friendly width


def rfnet_kernel(x_ref, w1t_ref, b1_ref, w2d_ref, b2d_ref, o_ref):
    """One batch tile (batch along lanes) of the 2-action policy forward.

    x_ref   : (IN_PAD, TB) f32  zero-padded, transposed states
    w1t_ref : (H, IN_PAD)  f32  fc1 weight (torch layout), zero-padded cols
    b1_ref  : (H, 1)       f32  fc1 bias as a column (broadcast over lanes)
    w2d_ref : (1, H)       f32  w2[:, 0] - w2[:, 1]
    b2d_ref : (1, 1)       f32  b2[0] - b2[1]
    o_ref   : (1, TB)      f32  p0 = softmax(logits)[:, 0] for each sample
    """
    # ---- fc1 + ReLU on the MXU (hidden along sublanes, batch along lanes) ---
    hT = jnp.dot(w1t_ref[...], x_ref[...], preferred_element_type=jnp.float32)
    hT = jnp.maximum(hT + b1_ref[...], 0.0)                      # (H, TB)

    # ---- fc2 + 2-class softmax ----------------------------------------------
    # softmax([l0, l1])[0] == sigmoid(l0 - l1): only the logit difference is
    # needed -> one more (1, H) x (H, TB) MXU dot, then sigmoid via EUP ops.
    d = jnp.dot(w2d_ref[...], hT, preferred_element_type=jnp.float32)
    d = d + b2d_ref[...]                                          # (1, TB)
    d = jnp.clip(d, -60.0, 60.0)                                  # keep exp finite
    o_ref[...] = pl.reciprocal(1.0 + jnp.exp(-d), approx=True)    # p0


def _round_up(n, m):
    return ((n + m - 1) // m) * m


def rfnet_forward(x, w1, b1, w2, b2, *, block_b=2048):
    """x: (B, state_dim); w1: (state_dim, hidden); b1: (1, hidden);
    w2: (hidden, action_dim); b2: (1, action_dim) -> (B, action_dim) probs."""
    B, state_dim = x.shape
    hidden = w1.shape[1]
    action_dim = w2.shape[1]
    assert action_dim == 2, "kernel specialized for CartPole's 2 actions"
    assert state_dim <= IN_PAD

    h_pad = _round_up(hidden, LANE)

    # Tile choice: lane-multiple, big enough to amortize per-step overhead,
    # but keep >= 2 grid steps at large batch so v7x's 2 TCs both get work.
    b_pad0 = _round_up(B, LANE)
    if b_pad0 >= 2 * LANE:
        block = min(block_b, _round_up(pl.cdiv(b_pad0, 2), LANE))
    else:
        block = b_pad0
    block = max(block, LANE)
    b_pad = _round_up(b_pad0, block)
    grid = (b_pad // block,)

    # Wrapper-side layout plumbing (cheap; keeps the kernel fully dense).
    x = x.astype(jnp.float32)
    xp = jnp.zeros((IN_PAD, b_pad), jnp.float32).at[:state_dim, :B].set(x.T)
    w1t = jnp.zeros((h_pad, IN_PAD), jnp.float32).at[:hidden, :state_dim].set(w1.T)
    b1c = jnp.zeros((h_pad, 1), jnp.float32).at[:hidden, 0].set(b1[0])
    w2d = jnp.zeros((1, h_pad), jnp.float32).at[0, :hidden].set(w2[:, 0] - w2[:, 1])
    b2d = (b2[:, 0:1] - b2[:, 1:2]).astype(jnp.float32)            # (1, 1)

    flops = 2 * h_pad * IN_PAD * b_pad + 2 * h_pad * b_pad + 4 * b_pad
    bytes_accessed = 4 * (xp.size + w1t.size + b1c.size + w2d.size + b2d.size
                          + b_pad)

    p0_pad = pl.pallas_call(
        rfnet_kernel,
        out_shape=jax.ShapeDtypeStruct((1, b_pad), jnp.float32),
        grid_spec=pltpu.PrefetchScalarGridSpec(
            num_scalar_prefetch=0,
            grid=grid,
            in_specs=[
                pl.BlockSpec((IN_PAD, block), lambda i: (0, i)),   # xT: tiled over batch
                pl.BlockSpec((h_pad, IN_PAD), lambda i: (0, 0)),   # weights stay resident
                pl.BlockSpec((h_pad, 1), lambda i: (0, 0)),
                pl.BlockSpec((1, h_pad), lambda i: (0, 0)),
                pl.BlockSpec((1, 1), lambda i: (0, 0)),
            ],
            out_specs=pl.BlockSpec((1, block), lambda i: (0, i)),  # p0 only, lane-dense
        ),
        compiler_params=pltpu.CompilerParams(
            dimension_semantics=("parallel",),
        ),
        cost_estimate=pl.CostEstimate(
            flops=flops, transcendentals=b_pad, bytes_accessed=bytes_accessed),
    )(xp, w1t, b1c, w2d, b2d)

    p0 = p0_pad[0, :B]
    return jnp.stack([p0, 1.0 - p0], axis=1)                      # (B, 2)


def rfnet_reference(x, w1, b1, w2, b2):
    h = jnp.maximum(x @ w1 + b1, 0.0)
    return jax.nn.softmax(h @ w2 + b2, axis=1)


def init_params(key, state_dim, hidden_dim, action_dim):
    """Deterministic init mimicking torch.nn.Linear defaults
    (uniform(-1/sqrt(fan_in), 1/sqrt(fan_in))); weights stored transposed."""
    k1, k2, k3, k4 = jax.random.split(key, 4)
    bound1 = 1.0 / jnp.sqrt(state_dim)
    bound2 = 1.0 / jnp.sqrt(hidden_dim)
    w1 = jax.random.uniform(k1, (state_dim, hidden_dim), jnp.float32,
                            -bound1, bound1)
    b1 = jax.random.uniform(k2, (1, hidden_dim), jnp.float32, -bound1, bound1)
    w2 = jax.random.uniform(k3, (hidden_dim, action_dim), jnp.float32,
                            -bound2, bound2)
    b2 = jax.random.uniform(k4, (1, action_dim), jnp.float32, -bound2, bound2)
    return w1, b1, w2, b2


if __name__ == "__main__":
    # CartPole-v0: state_dim=4, action_dim=2, hidden_dim=128
    state_dim, hidden_dim, action_dim = 4, 128, 2

    key = jax.random.PRNGKey(0)
    kx, kp, kb = jax.random.split(key, 3)
    w1, b1, w2, b2 = init_params(kp, state_dim, hidden_dim, action_dim)

    # Module-implied tiny shape (B=2): single 128-wide tile, 1 grid step.
    x_small = jax.random.normal(kx, (2, state_dim), dtype=jnp.float32)
    probs_small = rfnet_forward(x_small, w1, b1, w2, b2)
    jax.block_until_ready(probs_small)

    # Batched rollout-style call exercising the tiled, parallel grid over B
    # (b_pad=1024 -> 2 tiles of 512, so both v7x TensorCores get work).
    x_big = jax.random.normal(kb, (1000, state_dim), dtype=jnp.float32)
    probs_big = rfnet_forward(x_big, w1, b1, w2, b2)
    jax.block_until_ready(probs_big)

    for x_in, probs in ((x_small, probs_small), (x_big, probs_big)):
        ref = rfnet_reference(x_in, w1, b1, w2, b2)
        assert probs.shape == ref.shape
        assert jnp.allclose(jnp.sum(probs, axis=1), 1.0, atol=1e-5)
        assert jnp.allclose(probs, ref, atol=3e-3), \
            float(jnp.max(jnp.abs(probs - ref)))

    print("KERNEL_OK")
</pallas_src>

<mosaic_0001>
module attributes {stable_mosaic.version = 11 : i64} {
  func.func @rfnet_kernel(%arg0: i32, %arg1: memref<8x128xf32, #tpu.memory_space<vmem>>, %arg2: memref<128x8xf32, #tpu.memory_space<vmem>>, %arg3: memref<128x1xf32, #tpu.memory_space<vmem>>, %arg4: memref<1x128xf32, #tpu.memory_space<vmem>>, %arg5: memref<1x1xf32, #tpu.memory_space<vmem>>, %arg6: memref<1x128xf32, #tpu.memory_space<vmem>>) attributes {dimension_semantics = [#tpu.dimension_semantics<parallel>], iteration_bounds = array<i64: 1>, scalar_prefetch = 0 : i64, scratch_operands = 0 : i64, tpu.core_type = #tpu.core_type<tc>, window_params = [{transform_indices = @transform_0, window_bounds = array<i64: 8, 128>}, {pipeline_mode = #tpu.pipeline_mode<synchronous>, transform_indices = @transform_1, window_bounds = array<i64: 128, 8>}, {pipeline_mode = #tpu.pipeline_mode<synchronous>, transform_indices = @transform_2, window_bounds = array<i64: 128, 1>}, {pipeline_mode = #tpu.pipeline_mode<synchronous>, transform_indices = @transform_3, window_bounds = array<i64: 1, 128>}, {pipeline_mode = #tpu.pipeline_mode<synchronous>, transform_indices = @transform_4, window_bounds = array<i64: 1, 1>}, {transform_indices = @transform_5, window_bounds = array<i64: 1, 128>}]} {
    %c0 = arith.constant 0 : index
    %c0_0 = arith.constant 0 : index
    %0 = vector.load %arg2[%c0, %c0_0] : memref<128x8xf32, #tpu.memory_space<vmem>>, vector<128x8xf32>
    %c0_1 = arith.constant 0 : index
    %c0_2 = arith.constant 0 : index
    %1 = vector.load %arg1[%c0_1, %c0_2] : memref<8x128xf32, #tpu.memory_space<vmem>>, vector<8x128xf32>
    %cst = arith.constant dense<0.000000e+00> : vector<128x128xf32>
    %2 = tpu.matmul %0, %1, %cst {dimension_numbers = #tpu.dot_dimension_numbers<[1], [0], [0], [1], [0, 0, 1, 1], [], []>} : vector<128x8xf32>, vector<8x128xf32>, vector<128x128xf32> -> vector<128x128xf32>
    %c0_3 = arith.constant 0 : index
    %c0_4 = arith.constant 0 : index
    %3 = vector.load %arg3[%c0_3, %c0_4] : memref<128x1xf32, #tpu.memory_space<vmem>>, vector<128x1xf32>
    %4 = vector.broadcast %3 : vector<128x1xf32> to vector<128x128xf32>
    %5 = arith.addf %2, %4 : vector<128x128xf32>
    %cst_5 = arith.constant 0.000000e+00 : f32
    %6 = vector.broadcast %cst_5 : f32 to vector<128x128xf32>
    %7 = arith.maximumf %5, %6 : vector<128x128xf32>
    %c0_6 = arith.constant 0 : index
    %c0_7 = arith.constant 0 : index
    %8 = vector.load %arg4[%c0_6, %c0_7] : memref<1x128xf32, #tpu.memory_space<vmem>>, vector<1x128xf32>
    %cst_8 = arith.constant dense<0.000000e+00> : vector<1x128xf32>
    %9 = tpu.matmul %8, %7, %cst_8 {dimension_numbers = #tpu.dot_dimension_numbers<[1], [0], [0], [1], [0, 0, 1, 1], [], []>} : vector<1x128xf32>, vector<128x128xf32>, vector<1x128xf32> -> vector<1x128xf32>
    %c0_9 = arith.constant 0 : index
    %c0_10 = arith.constant 0 : index
    %10 = vector.load %arg5[%c0_9, %c0_10] : memref<1x1xf32, #tpu.memory_space<vmem>>, vector<1x1xf32>
    %11 = vector.broadcast %10 : vector<1x1xf32> to vector<1x128xf32>
    %12 = arith.addf %9, %11 : vector<1x128xf32>
    %cst_11 = arith.constant -6.000000e+01 : f32
    %cst_12 = arith.constant 6.000000e+01 : f32
    %13 = vector.broadcast %cst_11 : f32 to vector<1x128xf32>
    %14 = arith.maximumf %13, %12 : vector<1x128xf32>
    %15 = vector.broadcast %cst_12 : f32 to vector<1x128xf32>
    %16 = arith.minimumf %15, %14 : vector<1x128xf32>
    %cst_13 = arith.constant 0.000000e+00 : f32
    %17 = vector.broadcast %cst_13 : f32 to vector<1x128xf32>
    %18 = arith.subf %17, %16 : vector<1x128xf32>
    %19 = math.exp %18 : vector<1x128xf32>
    %cst_14 = arith.constant 1.000000e+00 : f32
    %20 = vector.broadcast %cst_14 : f32 to vector<1x128xf32>
    %21 = arith.addf %20, %19 : vector<1x128xf32>
    %22 = tpu.reciprocal %21 {approx = true} : vector<1x128xf32> -> vector<1x128xf32>
    %c0_15 = arith.constant 0 : index
    %c0_16 = arith.constant 0 : index
    %23 = vector.load %arg6[%c0_15, %c0_16] : memref<1x128xf32, #tpu.memory_space<vmem>>, vector<1x128xf32>
    tpu.vector_store %arg6[%c0_15, %c0_16], %22 {strides = array<i32>} : memref<1x128xf32, #tpu.memory_space<vmem>>, vector<1x128xf32>,
    return
  }
  func.func @transform_0(%arg0: i32) -> (i32, i32) {
    %c0_i32 = arith.constant 0 : i32
    %c0_i32_0 = arith.constant 0 : i32
    return %c0_i32, %arg0 : i32, i32
  }
  func.func @transform_1(%arg0: i32) -> (i32, i32) {
    %c0_i32 = arith.constant 0 : i32
    %c0_i32_0 = arith.constant 0 : i32
    %c0_i32_1 = arith.constant 0 : i32
    return %c0_i32, %c0_i32_0 : i32, i32
  }
  func.func @transform_2(%arg0: i32) -> (i32, i32) {
    %c0_i32 = arith.constant 0 : i32
    %c0_i32_0 = arith.constant 0 : i32
    %c0_i32_1 = arith.constant 0 : i32
    return %c0_i32, %c0_i32_0 : i32, i32
  }
  func.func @transform_3(%arg0: i32) -> (i32, i32) {
    %c0_i32 = arith.constant 0 : i32
    %c0_i32_0 = arith.constant 0 : i32
    %c0_i32_1 = arith.constant 0 : i32
    return %c0_i32, %c0_i32_0 : i32, i32
  }
  func.func @transform_4(%arg0: i32) -> (i32, i32) {
    %c0_i32 = arith.constant 0 : i32
    %c0_i32_0 = arith.constant 0 : i32
    %c0_i32_1 = arith.constant 0 : i32
    return %c0_i32, %c0_i32_0 : i32, i32
  }
  func.func @transform_5(%arg0: i32) -> (i32, i32) {
    %c0_i32 = arith.constant 0 : i32
    %c0_i32_0 = arith.constant 0 : i32
    return %c0_i32, %arg0 : i32, i32
  }
}

</mosaic_0001>

<bundles_post_ra>
// kernel: tpu_custom_call.1
= control target key start
LH: loop header
LB: loop body
LE: loop exit
PB: predicated region body
PF: predicated region fallthrough
CT: control target
= control target key end

     0   :  { %s796_s0 = inlined_call_operand.vmem [shape: f32[8,128], index: 0, kind: input, shape index: {}]   ;;  %s797_s1 = inlined_call_operand.vmem [shape: f32[128,8], index: 1, kind: input, shape index: {}]   ;;  %s798_s2 = inlined_call_operand.vmem [shape: f32[128,1], index: 2, kind: input, shape index: {}]   ;;  %s799_s3 = inlined_call_operand.vmem [shape: f32[1,128], index: 3, kind: input, shape index: {}]   ;;  %s800_s4 = inlined_call_operand.<no memory space> [shape: f32[1,1], index: 4, kind: input, shape index: {}]   ;;  %s801_s5 = inlined_call_operand.hbm [shape: f32[1,128], index: 5, kind: output, shape index: {}]  }
   0x1   :  { %v10_v0 = vstv %s800_s4 }
   0x2   :  { %11 = vst [vmem:[#allocation2] sm:$0x1] %v10_v0 }
   0x3   :  { %v39_v1 = vld [vmem:[%s796_s0] sm:$0xff]  ;;  %vm136_vm0 = vcmask 64512   ;;  %v24_v3 = vld [vmem:[%s797_s1 + $0x8] sm:$0xff]  ;;  %v25_v4 = vld [vmem:[%s797_s1 + $0x10] sm:$0xff]  ;;  %v620_v5 = vmov 0  }
   0x4   :  { %v23_v2 = vld [vmem:[%s797_s1] sm:$0xff]  ;;  %500 = vmatprep.subr.mxu0 %v39_v1  ;;  %590 = vset.pattern.permute.xlu0 %v620_v5  ;;  %v26_v6 = vld [vmem:[%s797_s1 + $0x18] sm:$0xff]  ;;  %v42_v9 = vld [vmem:[%s798_s2 + $0x10] sm:$0xff] }
   0x5   :  { %502 = vmatprep.mubr.msk.f32.mxu0 %vm136_vm0, %v23_v2  ;;  %501 = vmatpush3.msra.mxu0 %v39_v1  ;;  %v27_v7 = vld [vmem:[%s797_s1 + $0x20] sm:$0xff]  ;;  %v41_v10 = vld [vmem:[%s798_s2 + $0x8] sm:$0xff]  ;;  %v43_v12 = vld [vmem:[%s798_s2 + $0x18] sm:$0xff] }
   0x6   :  { %503 = vmatmul.mubr.msk.f32.vlgmr.msra.gmra.mrb[0].mxu0 %vm136_vm0, %v24_v3  ;;  %591 = vset.pattern.permute.xlu1 %v620_v5  ;;  %v40_v8 = vld [vmem:[%s798_s2] sm:$0xff]  ;;  %v28_v11 = vld [vmem:[%s797_s1 + $0x28] sm:$0xff]  ;;  %v29_v13 = vld [vmem:[%s797_s1 + $0x30] sm:$0xff] }
   0x7   :  { %505 = vmatprep.mubr.msk.f32.mxu0 %vm136_vm0, %v25_v4  ;;  %58 = vperm.xlu0 %590, %v40_v8   ;;  %v44_v14 = vld [vmem:[%s798_s2 + $0x20] sm:$0xff] }
   0x8   :  { %68 = vperm.xlu1 %591, %v42_v9  }
   0xa   :  { %506 = vmatmul.mubr.msk.f32.gmra.mrb[2].mxu0 %vm136_vm0, %v26_v6 }
   0xb   :  { %508 = vmatprep.mubr.msk.f32.mxu0 %vm136_vm0, %v27_v7  ;;  %63 = vperm.xlu0 %590, %v41_v10  }
   0xc   :  { %73 = vperm.xlu1 %591, %v43_v12  }
   0xe   :  { %509 = vmatmul.mubr.msk.f32.gmra.mrb[4].mxu0 %vm136_vm0, %v28_v11 }
   0xf   :  { %12 = vsyncpa [#allocation4], 0  ;;  %511 = vmatprep.mubr.msk.f32.mxu0 %vm136_vm0, %v29_v13  ;;  %v30_v15 = vld [vmem:[%s797_s1 + $0x38] sm:$0xff]  ;;  %v45_v16 = vld [vmem:[%s798_s2 + $0x28] sm:$0xff]  ;;  %78 = vperm.xlu0 %590, %v44_v14   ;;  %v621_v36 = vmov 0.0|0.0   ;;  %vm622_vm1 = vmmov 0  }
  0x10   :  { %v31_v17 = vld [vmem:[%s797_s1 + $0x40] sm:$0xff]  ;;  %v46_v18 = vld [vmem:[%s798_s2 + $0x30] sm:$0xff]  ;;  %83 = vperm.xlu1 %591, %v45_v16   ;;  %v32_v19 = vld [vmem:[%s797_s1 + $0x48] sm:$0xff]  ;;  %561 = vmatprep.subr.bf16.mxu1 %v621_v36  ;;  %v623_v37 = vmov 0.0   ;;  %s624_s30 = smov [#allocation3]  }
  0x11   :  { %v47_v20 = vld [vmem:[%s798_s2 + $0x38] sm:$0xff]  ;;  %v33_v21 = vld [vmem:[%s797_s1 + $0x50] sm:$0xff]  ;;  %v48_v22 = vld [vmem:[%s798_s2 + $0x40] sm:$0xff]  ;;  %558 = vmatprep.mubr.msk.f32.mxu1 %vm622_vm1, %v623_v37  ;;  %s441_s6 = sshll.u32 %s624_s30, 4  ;;  %s442_s6 = int_to_ptr.vmem [resolvable:$true] %s441_s6 }
  0x12   :  { %512 = vmatmul.mubr.msk.f32.gmra.mrb[6].mxu0 %vm136_vm0, %v30_v15  ;;  %v34_v23 = vld [vmem:[%s797_s1 + $0x58] sm:$0xff]  ;;  %v49_v24 = vld [vmem:[%s798_s2 + $0x48] sm:$0xff]  ;;  %v35_v25 = vld [vmem:[%s797_s1 + $0x60] sm:$0xff]  ;;  %s600_s7 = scalar_lea.vmem %s442_s6, 32  ;;  %p601_p1 = scmp.lt.s32.totalorder %s442_s6, %s442_s6 }
  0x13   :  { %514 = vmatprep.mubr.msk.f32.mxu0 %vm136_vm0, %v31_v17  ;;  %88 = vperm.xlu0 %590, %v46_v18   ;;  %v50_v26 = vld [vmem:[%s798_s2 + $0x50] sm:$0xff]  ;;  %v36_v27 = vld [vmem:[%s797_s1 + $0x68] sm:$0xff]  ;;  %v51_v28 = vld [vmem:[%s798_s2 + $0x58] sm:$0xff] }
  0x14   :  { %93 = vperm.xlu1 %591, %v47_v20   ;;  %v37_v29 = vld [vmem:[%s797_s1 + $0x70] sm:$0xff]  ;;  %v52_v30 = vld [vmem:[%s798_s2 + $0x60] sm:$0xff]  ;;  %v38_v31 = vld [vmem:[%s797_s1 + $0x78] sm:$0xff] }
  0x15   :  { %v53_v32 = vld [vmem:[%s798_s2 + $0x68] sm:$0xff]  ;;  %v54_v33 = vld [vmem:[%s798_s2 + $0x70] sm:$0xff]  ;;  %v55_v34 = vld [vmem:[%s798_s2 + $0x78] sm:$0xff] }
  0x16   :  { %515 = vmatmul.mubr.msk.f32.gmra.mrb[8].mxu0 %vm136_vm0, %v32_v19  ;;  %v347_v35 = vld [vmem:[#allocation2] sm:$0x1] }
  0x17   :  { %517 = vmatprep.mubr.msk.f32.mxu0 %vm136_vm0, %v33_v21  ;;  %98 = vperm.xlu0 %590, %v48_v22  }
  0x18   :  { %103 = vperm.xlu1 %591, %v49_v24  }
  0x1a   :  { %518 = vmatmul.mubr.msk.f32.gmra.mrb[10].mxu0 %vm136_vm0, %v34_v23 }
  0x1b   :  { %520 = vmatprep.mubr.msk.f32.mxu0 %vm136_vm0, %v35_v25  ;;  %108 = vperm.xlu0 %590, %v50_v26  }
  0x1c   :  { %113 = vperm.xlu1 %591, %v51_v28  }
  0x1e   :  { %521 = vmatmul.mubr.msk.f32.gmra.mrb[12].mxu0 %vm136_vm0, %v36_v27 }
  0x1f   :  { %523 = vmatprep.mubr.msk.f32.mxu0 %vm136_vm0, %v37_v29  ;;  %118 = vperm.xlu0 %590, %v52_v30  }
  0x20   :  { %123 = vperm.xlu1 %591, %v53_v32  }
  0x22   :  { %524 = vmatmul.mubr.msk.f32.gmra.mrb[14].mxu0 %vm136_vm0, %v38_v31 }
  0x23   :  { %128 = vperm.xlu0 %590, %v54_v33  }
  0x24   :  { %133 = vperm.xlu1 %591, %v55_v34  }
  0x27   :  { %350 = vperm.xlu0 %590, %v347_v35  }
  0x86   :  { %v59_v39 = vpop.permute.xlu0 %58 }
  0x87   :  { %v69_v38 = vpop.permute.xlu1 %68 }
  0x8a   :  { %v64_v41 = vpop.permute.xlu0 %63 }
  0x8b   :  { %v74_v40 = vpop.permute.xlu1 %73 }
  0x8e   :  { %v79_v43 = vpop.permute.xlu0 %78 }
  0x8f   :  { %v84_v42 = vpop.permute.xlu1 %83 }
  0x92   :  { %v89_v52 = vpop.permute.xlu0 %88 }
  0x93   :  { %v94_v49 = vpop.permute.xlu1 %93 }
  0x96   :  { %v99_v1 = vpop.permute.xlu0 %98 }
  0x97   :  { %v104_v62 = vpop.permute.xlu1 %103 }
  0x9a   :  { %v109_v13 = vpop.permute.xlu0 %108 }
  0x9b   :  { %v114_v10 = vpop.permute.xlu1 %113 }
  0x9e   :  { %v119_v26 = vpop.permute.xlu0 %118 }
  0x9f   :  { %v124_v23 = vpop.permute.xlu1 %123 }
  0xa3   :  { %v134_v35 = vpop.permute.xlu1 %133 }
  0xd9   :  { %v504_v44 = vpop.f32.mrb[0].mxu0 }
  0xda   :  { %v257_v45 = vadd.f32 %v504_v44, %v64_v41  ;;  %v251_v46 = vpop.f32.mrb[1].mxu0 }
  0xdb   :  { %v252_v47 = vadd.f32 %v251_v46, %v59_v39  ;;  %v129_v39 = vpop.permute.xlu0 %128 }
  0xdc   :  { %v331_v48 = vmax.f32 %v257_v45, 0.0 }
  0xdd   :  { %v330_v50 = vmax.f32 %v252_v47, 0.0  ;;  %v507_v51 = vpop.f32.mrb[2].mxu0  ;;  %v346_v47 = vld [vmem:[%s799_s3] sm:$0x1]  ;;  %s596_s3 = scalar_lea.vmem %s442_s6, 16 }
  0xde   :  { %v267_v53 = vadd.f32 %v507_v51, %v74_v40  ;;  %v261_v54 = vpop.f32.mrb[3].mxu0  ;;  %p597_p0 = scmp.ne.s32.totalorder %s442_s6, %s596_s3  ;;  %p602_p2 = scmp.lt.s32.totalorder %s600_s7, %s596_s3 }
  0xdf   :  { %v262_v55 = vadd.f32 %v261_v54, %v69_v38  ;;  %v562_v56 = vpack.c.bf16 %v331_v48, %v330_v50  ;;  %v353_v48 = vlaneseq  ;;  %v351_v51 = vpop.permute.xlu0 %350 }
  0xe0   :  { %v333_v57 = vmax.f32 %v267_v53, 0.0  ;;  %p603_p3 = por %p602_p2, %p601_p1 }
  0xe1   :  { %v332_v58 = vmax.f32 %v262_v55, 0.0  ;;  %v510_v59 = vpop.f32.mrb[4].mxu0  ;;  %563 = vmatpush3.bf16.msra.mxu1 %v562_v56 }
  0xe2   :  { %v277_v60 = vadd.f32 %v510_v59, %v84_v42  ;;  %v271_v61 = vpop.f32.mrb[5].mxu0  ;;  %564 = vmatprep.subr.bf16.mxu1 %v621_v36  ;;  %p604_p4 = pnand %p603_p3, %p597_p0 }
  0xe3   :  { %v565_v63 = vpack.c.bf16 %v333_v57, %v332_v58  ;;  %v272_v0 = vadd.f32 %v271_v61, %v79_v43 }
  0xe4   :  { %v335_v2 = vmax.f32 %v277_v60, 0.0 }
  0xe5   :  { %v334_v3 = vmax.f32 %v272_v0, 0.0  ;;  %v513_v4 = vpop.f32.mrb[6].mxu0  ;;  %566 = vmatpush3.bf16.msra.mxu1 %v565_v63 }
  0xe6   :  { %v287_v5 = vadd.f32 %v513_v4, %v94_v49  ;;  %v281_v6 = vpop.f32.mrb[7].mxu0  ;;  %567 = vmatprep.subr.bf16.mxu1 %v621_v36  ;;  %v354_v49 = vshrl.u32 %v353_v48, 7 }
  0xe7   :  { %v568_v7 = vpack.c.bf16 %v335_v2, %v334_v3  ;;  %v282_v8 = vadd.f32 %v281_v6, %v89_v52 }
  0xe8   :  { %v337_v9 = vmax.f32 %v287_v5, 0.0  ;;  %v355_v50 = vsub.s32 0, %v354_v49 }
  0xe9   :  { %v336_v11 = vmax.f32 %v282_v8, 0.0  ;;  %v516_v12 = vpop.f32.mrb[8].mxu0  ;;  %569 = vmatpush3.bf16.msra.mxu1 %v568_v7 }
  0xea   :  { %v297_v14 = vadd.f32 %v516_v12, %v104_v62  ;;  %v291_v15 = vpop.f32.mrb[9].mxu0  ;;  %570 = vmatprep.subr.bf16.mxu1 %v621_v36  ;;  %v356_v52 = vrot.slane %v351_v51, %v355_v50 }
  0xeb   :  { %v571_v16 = vpack.c.bf16 %v337_v9, %v336_v11  ;;  %v292_v17 = vadd.f32 %v291_v15, %v99_v1 }
  0xec   :  { %v339_v18 = vmax.f32 %v297_v14, 0.0 }
  0xed   :  { %v338_v19 = vmax.f32 %v292_v17, 0.0  ;;  %v519_v20 = vpop.f32.mrb[10].mxu0  ;;  %572 = vmatpush3.bf16.msra.mxu1 %v571_v16 }
  0xee   :  { %v307_v21 = vadd.f32 %v519_v20, %v114_v10  ;;  %v301_v22 = vpop.f32.mrb[11].mxu0  ;;  %573 = vmatprep.subr.bf16.mxu1 %v621_v36 }
  0xef   :  { %v574_v24 = vpack.c.bf16 %v339_v18, %v338_v19  ;;  %v302_v25 = vadd.f32 %v301_v22, %v109_v13 }
  0xf0   :  { %v341_v27 = vmax.f32 %v307_v21, 0.0 }
  0xf1   :  { %v340_v28 = vmax.f32 %v302_v25, 0.0  ;;  %v522_v29 = vpop.f32.mrb[12].mxu0  ;;  %575 = vmatpush3.bf16.msra.mxu1 %v574_v24 }
  0xf2   :  { %v317_v30 = vadd.f32 %v522_v29, %v124_v23  ;;  %v311_v31 = vpop.f32.mrb[13].mxu0  ;;  %576 = vmatprep.subr.bf16.mxu1 %v621_v36 }
  0xf3   :  { %v577_v32 = vpack.c.bf16 %v341_v27, %v340_v28  ;;  %v312_v33 = vadd.f32 %v311_v31, %v119_v26 }
  0xf4   :  { %v343_v34 = vmax.f32 %v317_v30, 0.0 }
  0xf5   :  { %v342_v37 = vmax.f32 %v312_v33, 0.0  ;;  %v525_v38 = vpop.f32.mrb[14].mxu0  ;;  %578 = vmatpush3.bf16.msra.mxu1 %v577_v32 }
  0xf6   :  { %v327_v40 = vadd.f32 %v525_v38, %v134_v35  ;;  %v321_v41 = vpop.f32.mrb[15].mxu0  ;;  %579 = vmatprep.subr.bf16.mxu1 %v621_v36 }
  0xf7   :  { %v580_v42 = vpack.c.bf16 %v343_v34, %v342_v37  ;;  %v322_v43 = vadd.f32 %v321_v41, %v129_v39 }
  0xf8   :  { %v345_v44 = vmax.f32 %v327_v40, 0.0 }
  0xf9   :  { %v344_v45 = vmax.f32 %v322_v43, 0.0  ;;  %581 = vmatpush3.bf16.msra.mxu1 %v580_v42 }
  0xfa   :  { %582 = vmatprep.subr.bf16.mxu1 %v621_v36 }
  0xfb   :  { %v583_v46 = vpack.c.bf16 %v345_v44, %v344_v45 }
  0xfd   :  { %584 = vmatpush3.bf16.msra.mxu1 %v583_v46 }
 0x100   :  { %559 = vmatmul.mubr.f32.vlgmr.msra.gmra.mrb[0].mxu1 %v346_v47 }
 0x1d3   :  { %v423_v53 = vpop.f32.mrb[0].mxu1 }
 0x1d4   :  { %v424_v54 = vadd.f32 %v423_v53, %v356_v52  ;;  %v560_v55 = vpop.f32.mrb[1].mxu1 }
 0x1d6   :  { %v465_v56 = vclamps-f32 %v424_v54, 60.0 }
 0x1d8   :  { %v429_v57 = vsub.f32 0.0, %v465_v56 }
 0x1da   :  { %v430_v58 = vmul.f32 1.442695, %v429_v57 }
 0x1dc   :  { %592 = vpow2.f32 %v430_v58 }
 0x1e6   :  { %v593_v36 = vpop.eup %592 }
 0x1e7   :  { %v432_v59 = vadd.f32 1.0, %v593_v36 }
 0x1e9   :  { %594 = vrcp.f32 %v432_v59 }
 0x1f3   :  { %v595_v60 = vpop.eup %594 }
 0x1f4   :  { %434 = vst [vmem:[#allocation3] sm:$0x1] %v595_v60 }
 0x1f5   :  { %607 = shalt.err (!%p604_p4)
}
 0x1f6   :  { %s608_s10 = scalar_lea.hbm %s801_s5, 16 }
 0x1f7   :  { %p609_p5 = scmp.ne.s32.totalorder %s801_s5, %s608_s10  ;;  %p612_p6 = scmp.lt.u32.totalorder %s608_s10, %s801_s5 }
 0x1f9   :  { %p614_p7 = pnand %p612_p6, %p609_p5 }
 0x1fb   :  { %617 = shalt.err (!%p614_p7)
}
 0x1fc   :  { %444 = dma.vmem_to_hbm [thread:$0]  %s442_s6, 16, %s801_s5, [#allocation4]  }
 0x1fd   :  { %618 = dma.done.wait [#allocation4], 16  }
 0x1fe   :  { %619 = vsyncadd [#allocation4], 4294967280 }
 0x1ff   :  { %448 = vsyncpa [#allocation4], 1 }

</bundles_post_ra>
